<compile_context>
chip_gen: v5e
topology: v5e:2x2
jax: 0.10.0
libtpu: 0.0.40
codegen_flags: <defaults>
</compile_context>

<pallas_src>
import math

import jax
import jax.numpy as jnp
from jax.experimental import pallas as pl
from jax.experimental.pallas import tpu as pltpu

N_FEATURES = 16                       # len(CFG.features)
HIDDEN = (100, 50, 30, 10, 1)
DROPOUT_PS = (0.5, 0.2, 0.1, 0.1)


def mlp_kernel(x_ref,
               w1_ref, b1_ref, w2_ref, b2_ref, w3_ref, b3_ref,
               w4_ref, b4_ref, w5_ref, b5_ref,
               m1_ref, m2_ref, m3_ref, m4_ref,
               o_ref):
    """x_ref: (F, tile_b); w_i: (out, in) bf16; b_i: (out, 1) f32;
    m_i: (hidden_i, tile_b) f32 inverted-dropout masks; o_ref: (1, tile_b)."""

    def layer(w_ref, b_ref, h_bf16, mask_ref=None, relu=True):
        z = jnp.dot(w_ref[...], h_bf16,
                    preferred_element_type=jnp.float32)      # (out, tile_b) f32
        z = z + b_ref[...]                                   # (out,1) lane-broadcast
        if relu:
            z = jnp.maximum(z, 0.0)
        if mask_ref is not None:
            z = z * mask_ref[...]        # keep/(1-p) mask, scale pre-folded
        return z

    h = x_ref[...].astype(jnp.bfloat16)                      # (16, tile_b)
    h = layer(w1_ref, b1_ref, h, m1_ref).astype(jnp.bfloat16)
    h = layer(w2_ref, b2_ref, h, m2_ref).astype(jnp.bfloat16)
    h = layer(w3_ref, b3_ref, h, m3_ref).astype(jnp.bfloat16)
    h = layer(w4_ref, b4_ref, h, m4_ref).astype(jnp.bfloat16)
    out = layer(w5_ref, b5_ref, h, None, relu=False)         # (1, tile_b)
    o_ref[...] = out.astype(o_ref.dtype)                     # lane-dense store


def init_params(key):
    """torch.nn.Linear default init: W (out,in), b (out,) ~ U(-1/sqrt(in), 1/sqrt(in))."""
    dims = (N_FEATURES,) + HIDDEN
    params = []
    for i in range(len(HIDDEN)):
        fan_in, fan_out = dims[i], dims[i + 1]
        key, kw, kb = jax.random.split(key, 3)
        bound = 1.0 / math.sqrt(fan_in)
        w = jax.random.uniform(kw, (fan_out, fan_in), jnp.float32, -bound, bound)
        b = jax.random.uniform(kb, (fan_out, 1), jnp.float32, -bound, bound)
        params.append((w, b))
    return params


def neural_network_forward(x, params, dropout_key, *, tile_b=256):
    """x: (B, F) float32 (torch layout). Returns (B, 1) float32."""
    B, F = x.shape
    assert F == N_FEATURES
    assert tile_b % 128 == 0, "tile_b must be a multiple of 128 (lane width)"

    num_tiles = pl.cdiv(B, tile_b)
    Bp = num_tiles * tile_b

    # Feature-major activation layout: (F, B), padded batch on the lane axis.
    xt = x.T.astype(jnp.bfloat16)
    if Bp != B:
        xt = jnp.pad(xt, ((0, 0), (0, Bp - B)))

    # Inverted-dropout masks with the 1/(1-p) scale folded in (generated host/XLA
    # side; applied as a single in-kernel multiply).
    masks = []
    key = dropout_key
    for dim, p in zip(HIDDEN[:-1], DROPOUT_PS):
        key, sub = jax.random.split(key)
        keep = jax.random.bernoulli(sub, 1.0 - p, (dim, Bp))
        masks.append(keep.astype(jnp.float32) * jnp.float32(1.0 / (1.0 - p)))

    # Weights as bf16 MXU operands; biases stay f32.
    flat_wb = []
    for w, b in params:
        flat_wb.append(w.astype(jnp.bfloat16))
        flat_wb.append(b.astype(jnp.float32))

    def const_spec(shape):
        return pl.BlockSpec(shape, lambda i: (0, 0))

    wb_specs = [const_spec(a.shape) for a in flat_wb]
    mask_specs = [pl.BlockSpec((dim, tile_b), lambda i: (0, i))
                  for dim in HIDDEN[:-1]]

    out = pl.pallas_call(
        mlp_kernel,
        out_shape=jax.ShapeDtypeStruct((1, Bp), jnp.float32),
        grid_spec=pltpu.PrefetchScalarGridSpec(
            num_scalar_prefetch=0,
            grid=(num_tiles,),
            in_specs=[pl.BlockSpec((F, tile_b), lambda i: (0, i))]
                     + wb_specs + mask_specs,
            out_specs=pl.BlockSpec((1, tile_b), lambda i: (0, i)),
        ),
        compiler_params=pltpu.CompilerParams(
            dimension_semantics=("parallel",)),   # v7x: shard batch tiles over 2 TCs
    )(xt, *flat_wb, *masks)

    return out[0, :B].reshape(B, 1)


if __name__ == "__main__":
    key = jax.random.PRNGKey(0)
    k_params, k_x, k_drop = jax.random.split(key, 3)

    params = init_params(k_params)

    B = 256
    x = jax.random.normal(k_x, (B, N_FEATURES), jnp.float32)

    out = neural_network_forward(x, params, k_drop, tile_b=256)
    out = jax.block_until_ready(out)

    assert out.shape == (B, 1) and out.dtype == jnp.float32
    assert bool(jnp.all(jnp.isfinite(out)))
    print("KERNEL_OK")
</pallas_src>

<mosaic_0001>
module attributes {stable_mosaic.version = 11 : i64} {
  func.func @mlp_kernel(%arg0: i32, %arg1: memref<16x256xbf16, #tpu.memory_space<vmem>>, %arg2: memref<100x16xbf16, #tpu.memory_space<vmem>>, %arg3: memref<100x1xf32, #tpu.memory_space<vmem>>, %arg4: memref<50x100xbf16, #tpu.memory_space<vmem>>, %arg5: memref<50x1xf32, #tpu.memory_space<vmem>>, %arg6: memref<30x50xbf16, #tpu.memory_space<vmem>>, %arg7: memref<30x1xf32, #tpu.memory_space<vmem>>, %arg8: memref<10x30xbf16, #tpu.memory_space<vmem>>, %arg9: memref<10x1xf32, #tpu.memory_space<vmem>>, %arg10: memref<1x10xbf16, #tpu.memory_space<vmem>>, %arg11: memref<1x1xf32, #tpu.memory_space<vmem>>, %arg12: memref<100x256xf32, #tpu.memory_space<vmem>>, %arg13: memref<50x256xf32, #tpu.memory_space<vmem>>, %arg14: memref<30x256xf32, #tpu.memory_space<vmem>>, %arg15: memref<10x256xf32, #tpu.memory_space<vmem>>, %arg16: memref<1x256xf32, #tpu.memory_space<vmem>>) attributes {dimension_semantics = [#tpu.dimension_semantics<parallel>], iteration_bounds = array<i64: 1>, scalar_prefetch = 0 : i64, scratch_operands = 0 : i64, tpu.core_type = #tpu.core_type<tc>, window_params = [{transform_indices = @transform_0, window_bounds = array<i64: 16, 256>}, {pipeline_mode = #tpu.pipeline_mode<synchronous>, transform_indices = @transform_1, window_bounds = array<i64: 100, 16>}, {pipeline_mode = #tpu.pipeline_mode<synchronous>, transform_indices = @transform_2, window_bounds = array<i64: 100, 1>}, {pipeline_mode = #tpu.pipeline_mode<synchronous>, transform_indices = @transform_3, window_bounds = array<i64: 50, 100>}, {pipeline_mode = #tpu.pipeline_mode<synchronous>, transform_indices = @transform_4, window_bounds = array<i64: 50, 1>}, {pipeline_mode = #tpu.pipeline_mode<synchronous>, transform_indices = @transform_5, window_bounds = array<i64: 30, 50>}, {pipeline_mode = #tpu.pipeline_mode<synchronous>, transform_indices = @transform_6, window_bounds = array<i64: 30, 1>}, {pipeline_mode = #tpu.pipeline_mode<synchronous>, transform_indices = @transform_7, window_bounds = array<i64: 10, 30>}, {pipeline_mode = #tpu.pipeline_mode<synchronous>, transform_indices = @transform_8, window_bounds = array<i64: 10, 1>}, {pipeline_mode = #tpu.pipeline_mode<synchronous>, transform_indices = @transform_9, window_bounds = array<i64: 1, 10>}, {pipeline_mode = #tpu.pipeline_mode<synchronous>, transform_indices = @transform_10, window_bounds = array<i64: 1, 1>}, {transform_indices = @transform_11, window_bounds = array<i64: 100, 256>}, {transform_indices = @transform_12, window_bounds = array<i64: 50, 256>}, {transform_indices = @transform_13, window_bounds = array<i64: 30, 256>}, {transform_indices = @transform_14, window_bounds = array<i64: 10, 256>}, {transform_indices = @transform_15, window_bounds = array<i64: 1, 256>}]} {
    %c0 = arith.constant 0 : index
    %c0_0 = arith.constant 0 : index
    %0 = vector.load %arg1[%c0, %c0_0] : memref<16x256xbf16, #tpu.memory_space<vmem>>, vector<16x256xbf16>
    %c0_1 = arith.constant 0 : index
    %c0_2 = arith.constant 0 : index
    %1 = vector.load %arg2[%c0_1, %c0_2] : memref<100x16xbf16, #tpu.memory_space<vmem>>, vector<100x16xbf16>
    %cst = arith.constant dense<0.000000e+00> : vector<100x256xf32>
    %2 = tpu.matmul %1, %0, %cst {dimension_numbers = #tpu.dot_dimension_numbers<[1], [0], [0], [1], [0, 0, 1, 1], [], []>} : vector<100x16xbf16>, vector<16x256xbf16>, vector<100x256xf32> -> vector<100x256xf32>
    %c0_3 = arith.constant 0 : index
    %c0_4 = arith.constant 0 : index
    %3 = vector.load %arg3[%c0_3, %c0_4] : memref<100x1xf32, #tpu.memory_space<vmem>>, vector<100x1xf32>
    %4 = vector.broadcast %3 : vector<100x1xf32> to vector<100x256xf32>
    %5 = arith.addf %2, %4 : vector<100x256xf32>
    %cst_5 = arith.constant 0.000000e+00 : f32
    %6 = vector.broadcast %cst_5 : f32 to vector<100x256xf32>
    %7 = arith.maximumf %5, %6 : vector<100x256xf32>
    %c0_6 = arith.constant 0 : index
    %c0_7 = arith.constant 0 : index
    %8 = vector.load %arg12[%c0_6, %c0_7] : memref<100x256xf32, #tpu.memory_space<vmem>>, vector<100x256xf32>
    %9 = arith.mulf %7, %8 : vector<100x256xf32>
    %10 = arith.truncf %9 : vector<100x256xf32> to vector<100x256xbf16>
    %c0_8 = arith.constant 0 : index
    %c0_9 = arith.constant 0 : index
    %11 = vector.load %arg4[%c0_8, %c0_9] : memref<50x100xbf16, #tpu.memory_space<vmem>>, vector<50x100xbf16>
    %cst_10 = arith.constant dense<0.000000e+00> : vector<50x256xf32>
    %12 = tpu.matmul %11, %10, %cst_10 {dimension_numbers = #tpu.dot_dimension_numbers<[1], [0], [0], [1], [0, 0, 1, 1], [], []>} : vector<50x100xbf16>, vector<100x256xbf16>, vector<50x256xf32> -> vector<50x256xf32>
    %c0_11 = arith.constant 0 : index
    %c0_12 = arith.constant 0 : index
    %13 = vector.load %arg5[%c0_11, %c0_12] : memref<50x1xf32, #tpu.memory_space<vmem>>, vector<50x1xf32>
    %14 = vector.broadcast %13 : vector<50x1xf32> to vector<50x256xf32>
    %15 = arith.addf %12, %14 : vector<50x256xf32>
    %cst_13 = arith.constant 0.000000e+00 : f32
    %16 = vector.broadcast %cst_13 : f32 to vector<50x256xf32>
    %17 = arith.maximumf %15, %16 : vector<50x256xf32>
    %c0_14 = arith.constant 0 : index
    %c0_15 = arith.constant 0 : index
    %18 = vector.load %arg13[%c0_14, %c0_15] : memref<50x256xf32, #tpu.memory_space<vmem>>, vector<50x256xf32>
    %19 = arith.mulf %17, %18 : vector<50x256xf32>
    %20 = arith.truncf %19 : vector<50x256xf32> to vector<50x256xbf16>
    %c0_16 = arith.constant 0 : index
    %c0_17 = arith.constant 0 : index
    %21 = vector.load %arg6[%c0_16, %c0_17] : memref<30x50xbf16, #tpu.memory_space<vmem>>, vector<30x50xbf16>
    %cst_18 = arith.constant dense<0.000000e+00> : vector<30x256xf32>
    %22 = tpu.matmul %21, %20, %cst_18 {dimension_numbers = #tpu.dot_dimension_numbers<[1], [0], [0], [1], [0, 0, 1, 1], [], []>} : vector<30x50xbf16>, vector<50x256xbf16>, vector<30x256xf32> -> vector<30x256xf32>
    %c0_19 = arith.constant 0 : index
    %c0_20 = arith.constant 0 : index
    %23 = vector.load %arg7[%c0_19, %c0_20] : memref<30x1xf32, #tpu.memory_space<vmem>>, vector<30x1xf32>
    %24 = vector.broadcast %23 : vector<30x1xf32> to vector<30x256xf32>
    %25 = arith.addf %22, %24 : vector<30x256xf32>
    %cst_21 = arith.constant 0.000000e+00 : f32
    %26 = vector.broadcast %cst_21 : f32 to vector<30x256xf32>
    %27 = arith.maximumf %25, %26 : vector<30x256xf32>
    %c0_22 = arith.constant 0 : index
    %c0_23 = arith.constant 0 : index
    %28 = vector.load %arg14[%c0_22, %c0_23] : memref<30x256xf32, #tpu.memory_space<vmem>>, vector<30x256xf32>
    %29 = arith.mulf %27, %28 : vector<30x256xf32>
    %30 = arith.truncf %29 : vector<30x256xf32> to vector<30x256xbf16>
    %c0_24 = arith.constant 0 : index
    %c0_25 = arith.constant 0 : index
    %31 = vector.load %arg8[%c0_24, %c0_25] : memref<10x30xbf16, #tpu.memory_space<vmem>>, vector<10x30xbf16>
    %cst_26 = arith.constant dense<0.000000e+00> : vector<10x256xf32>
    %32 = tpu.matmul %31, %30, %cst_26 {dimension_numbers = #tpu.dot_dimension_numbers<[1], [0], [0], [1], [0, 0, 1, 1], [], []>} : vector<10x30xbf16>, vector<30x256xbf16>, vector<10x256xf32> -> vector<10x256xf32>
    %c0_27 = arith.constant 0 : index
    %c0_28 = arith.constant 0 : index
    %33 = vector.load %arg9[%c0_27, %c0_28] : memref<10x1xf32, #tpu.memory_space<vmem>>, vector<10x1xf32>
    %34 = vector.broadcast %33 : vector<10x1xf32> to vector<10x256xf32>
    %35 = arith.addf %32, %34 : vector<10x256xf32>
    %cst_29 = arith.constant 0.000000e+00 : f32
    %36 = vector.broadcast %cst_29 : f32 to vector<10x256xf32>
    %37 = arith.maximumf %35, %36 : vector<10x256xf32>
    %c0_30 = arith.constant 0 : index
    %c0_31 = arith.constant 0 : index
    %38 = vector.load %arg15[%c0_30, %c0_31] : memref<10x256xf32, #tpu.memory_space<vmem>>, vector<10x256xf32>
    %39 = arith.mulf %37, %38 : vector<10x256xf32>
    %40 = arith.truncf %39 : vector<10x256xf32> to vector<10x256xbf16>
    %c0_32 = arith.constant 0 : index
    %c0_33 = arith.constant 0 : index
    %41 = vector.load %arg10[%c0_32, %c0_33] : memref<1x10xbf16, #tpu.memory_space<vmem>>, vector<1x10xbf16>
    %cst_34 = arith.constant dense<0.000000e+00> : vector<1x256xf32>
    %42 = tpu.matmul %41, %40, %cst_34 {dimension_numbers = #tpu.dot_dimension_numbers<[1], [0], [0], [1], [0, 0, 1, 1], [], []>} : vector<1x10xbf16>, vector<10x256xbf16>, vector<1x256xf32> -> vector<1x256xf32>
    %c0_35 = arith.constant 0 : index
    %c0_36 = arith.constant 0 : index
    %43 = vector.load %arg11[%c0_35, %c0_36] : memref<1x1xf32, #tpu.memory_space<vmem>>, vector<1x1xf32>
    %44 = vector.broadcast %43 : vector<1x1xf32> to vector<1x256xf32>
    %45 = arith.addf %42, %44 : vector<1x256xf32>
    %c0_37 = arith.constant 0 : index
    %c0_38 = arith.constant 0 : index
    %46 = vector.load %arg16[%c0_37, %c0_38] : memref<1x256xf32, #tpu.memory_space<vmem>>, vector<1x256xf32>
    tpu.vector_store %arg16[%c0_37, %c0_38], %45 {strides = array<i32>} : memref<1x256xf32, #tpu.memory_space<vmem>>, vector<1x256xf32>,
    return
  }
  func.func @transform_0(%arg0: i32) -> (i32, i32) {
    %c0_i32 = arith.constant 0 : i32
    %c0_i32_0 = arith.constant 0 : i32
    return %c0_i32, %arg0 : i32, i32
  }
  func.func @transform_1(%arg0: i32) -> (i32, i32) {
    %c0_i32 = arith.constant 0 : i32
    %c0_i32_0 = arith.constant 0 : i32
    %c0_i32_1 = arith.constant 0 : i32
    return %c0_i32, %c0_i32_0 : i32, i32
  }
  func.func @transform_2(%arg0: i32) -> (i32, i32) {
    %c0_i32 = arith.constant 0 : i32
    %c0_i32_0 = arith.constant 0 : i32
    %c0_i32_1 = arith.constant 0 : i32
    return %c0_i32, %c0_i32_0 : i32, i32
  }
  func.func @transform_3(%arg0: i32) -> (i32, i32) {
    %c0_i32 = arith.constant 0 : i32
    %c0_i32_0 = arith.constant 0 : i32
    %c0_i32_1 = arith.constant 0 : i32
    return %c0_i32, %c0_i32_0 : i32, i32
  }
  func.func @transform_4(%arg0: i32) -> (i32, i32) {
    %c0_i32 = arith.constant 0 : i32
    %c0_i32_0 = arith.constant 0 : i32
    %c0_i32_1 = arith.constant 0 : i32
    return %c0_i32, %c0_i32_0 : i32, i32
  }
  func.func @transform_5(%arg0: i32) -> (i32, i32) {
    %c0_i32 = arith.constant 0 : i32
    %c0_i32_0 = arith.constant 0 : i32
    %c0_i32_1 = arith.constant 0 : i32
    return %c0_i32, %c0_i32_0 : i32, i32
  }
  func.func @transform_6(%arg0: i32) -> (i32, i32) {
    %c0_i32 = arith.constant 0 : i32
    %c0_i32_0 = arith.constant 0 : i32
    %c0_i32_1 = arith.constant 0 : i32
    return %c0_i32, %c0_i32_0 : i32, i32
  }
  func.func @transform_7(%arg0: i32) -> (i32, i32) {
    %c0_i32 = arith.constant 0 : i32
    %c0_i32_0 = arith.constant 0 : i32
    %c0_i32_1 = arith.constant 0 : i32
    return %c0_i32, %c0_i32_0 : i32, i32
  }
  func.func @transform_8(%arg0: i32) -> (i32, i32) {
    %c0_i32 = arith.constant 0 : i32
    %c0_i32_0 = arith.constant 0 : i32
    %c0_i32_1 = arith.constant 0 : i32
    return %c0_i32, %c0_i32_0 : i32, i32
  }
  func.func @transform_9(%arg0: i32) -> (i32, i32) {
    %c0_i32 = arith.constant 0 : i32
    %c0_i32_0 = arith.constant 0 : i32
    %c0_i32_1 = arith.constant 0 : i32
    return %c0_i32, %c0_i32_0 : i32, i32
  }
  func.func @transform_10(%arg0: i32) -> (i32, i32) {
    %c0_i32 = arith.constant 0 : i32
    %c0_i32_0 = arith.constant 0 : i32
    %c0_i32_1 = arith.constant 0 : i32
    return %c0_i32, %c0_i32_0 : i32, i32
  }
  func.func @transform_11(%arg0: i32) -> (i32, i32) {
    %c0_i32 = arith.constant 0 : i32
    %c0_i32_0 = arith.constant 0 : i32
    return %c0_i32, %arg0 : i32, i32
  }
  func.func @transform_12(%arg0: i32) -> (i32, i32) {
    %c0_i32 = arith.constant 0 : i32
    %c0_i32_0 = arith.constant 0 : i32
    return %c0_i32, %arg0 : i32, i32
  }
  func.func @transform_13(%arg0: i32) -> (i32, i32) {
    %c0_i32 = arith.constant 0 : i32
    %c0_i32_0 = arith.constant 0 : i32
    return %c0_i32, %arg0 : i32, i32
  }
  func.func @transform_14(%arg0: i32) -> (i32, i32) {
    %c0_i32 = arith.constant 0 : i32
    %c0_i32_0 = arith.constant 0 : i32
    return %c0_i32, %arg0 : i32, i32
  }
  func.func @transform_15(%arg0: i32) -> (i32, i32) {
    %c0_i32 = arith.constant 0 : i32
    %c0_i32_0 = arith.constant 0 : i32
    return %c0_i32, %arg0 : i32, i32
  }
}

</mosaic_0001>

<bundles_post_ra>
// kernel: tpu_custom_call.1
= control target key start
LH: loop header
LB: loop body
LE: loop exit
PB: predicated region body
PF: predicated region fallthrough
CT: control target
= control target key end

     0   :  { %s1485_s0 = inlined_call_operand.vmem [shape: bf16[16,256], index: 0, kind: input, shape index: {}]   ;;  %s1486_s1 = inlined_call_operand.vmem [shape: bf16[100,16], index: 1, kind: input, shape index: {}]   ;;  %s1487_s2 = inlined_call_operand.vmem [shape: f32[100,1], index: 2, kind: input, shape index: {}]   ;;  %s1488_s3 = inlined_call_operand.vmem [shape: bf16[50,100], index: 3, kind: input, shape index: {}]   ;;  %s1489_s4 = inlined_call_operand.vmem [shape: f32[50,1], index: 4, kind: input, shape index: {}]   ;;  %s1490_s5 = inlined_call_operand.hbm [shape: bf16[30,50], index: 5, kind: input, shape index: {}]   ;;  %s1491_s6 = inlined_call_operand.vmem [shape: f32[30,1], index: 6, kind: input, shape index: {}]   ;;  %s1492_s7 = inlined_call_operand.vmem [shape: bf16[10,30], index: 7, kind: input, shape index: {}]   ;;  %s1493_s8 = inlined_call_operand.vmem [shape: f32[10,1], index: 8, kind: input, shape index: {}]   ;;  %s1494_s9 = inlined_call_operand.vmem [shape: bf16[1,10], index: 9, kind: input, shape index: {}]   ;;  %s1495_s10 = inlined_call_operand.<no memory space> [shape: f32[1,1], index: 10, kind: input, shape index: {}]   ;;  %s1496_s11 = inlined_call_operand.hbm [shape: f32[100,256], index: 11, kind: input, shape index: {}]   ;;  %s1497_s12 = inlined_call_operand.vmem [shape: f32[50,256], index: 12, kind: input, shape index: {}]   ;;  %s1498_s13 = inlined_call_operand.vmem [shape: f32[30,256], index: 13, kind: input, shape index: {}]   ;;  %s1499_s14 = inlined_call_operand.vmem [shape: f32[10,256], index: 14, kind: input, shape index: {}]   ;;  %s1500_s15 = inlined_call_operand.hbm [shape: f32[1,256], index: 15, kind: output, shape index: {}]  }
   0x1   :  { %v20_v0 = vstv %s1495_s10 }
   0x2   :  { %21 = vst [vmem:[#allocation2] sm:$0x1] %v20_v0 }
   0x3   :  { %22 = vsyncpa [#allocation4], 0 }
   0x4   :  { %23 = vsyncpa [#allocation7], 0 }
   0x5   :  { %24 = vsyncpa [#allocation5], 0  ;;  %s39_s22 = sshll.u32 %s1490_s5, 4  ;;  %s1067_s23 = smov [#allocation3]   ;;  %s40_s22 = int_to_ptr.hbm [resolvable:$true] %s39_s22 }
   0x6   :  { %s41_s24 = sshll.u32 %s1067_s23, 4  ;;  %s62_s27 = sshll.u32 %s1496_s11, 4  ;;  %s42_s24 = int_to_ptr.vmem [resolvable:$true] %s41_s24  ;;  %s63_s27 = int_to_ptr.hbm [resolvable:$true] %s62_s27 }
   0x7   :  { %s1068_s28 = smov 64   ;;  %s1069_s29 = smov 4  }
   0x8   :  { %47 = dma.hbm_to_vmem [thread:$0]  %s40_s22, 256, %s42_s24, [#allocation4], %s1068_s28, %s1068_s28, %s1069_s29  }
   0x9   :  { %s1070_s10 = smov [#allocation6]   ;;  %s1071_s16 = smov 256  }
   0xa   :  { %s64_s30 = sshll.u32 %s1070_s10, 4  ;;  %s1072_s17 = smov 16   ;;  %s65_s30 = int_to_ptr.vmem [resolvable:$true] %s64_s30 }
   0xb   :  { %70 = dma.hbm_to_vmem [thread:$0]  %s63_s27, 3328, %s65_s30, [#allocation7], %s1071_s16, %s1071_s16, %s1072_s17  }
   0xc   :  { %1061 = dma.done.wait [#allocation4], 256  }
   0xd   :  { %1062 = vsyncadd [#allocation4], 4294967040 }
   0xe   :  { %1063 = dma.done.wait [#allocation7], 3328  }
   0xf   :  { %1064 = vsyncadd [#allocation7], 4294963968  ;;  %v1073_v1 = vmov 0   ;;  %v113_v2 = vld [vmem:[%s1487_s2 + $0x60] sm:$0xf]  ;;  %v112_v10 = vld [vmem:[%s1487_s2 + $0x58] sm:$0xff] }
  0x10   :  { %986 = vset.pattern.permute.xlu0 %v1073_v1  ;;  %988 = vset.pattern.permute.xlu2 %v1073_v1  ;;  %v904_v3 = vld [vmem:[%s1485_s0] sm:$0xf]  ;;  %v965_v4 = vld [vmem:[%s1485_s0 + $0x4] sm:$0xf0]  ;;  %v964_v6 = vld [vmem:[%s1485_s0 + $0x4] sm:$0xf] }
  0x11   :  { %987 = vset.pattern.permute.xlu1 %v1073_v1  ;;  %176 = vperm.xlu0 %986, %v113_v2   ;;  %v905_v5 = vor.u32 %v965_v4, %v904_v3  ;;  %v906_v7 = vld [vmem:[%s1485_s0 + $0x8] sm:$0xf0]  ;;  %v966_v9 = vld [vmem:[%s1486_s1] sm:$0xff]  ;;  %vm222_vm0 = vcmask 130048   ;;  %v111_v12 = vld [vmem:[%s1487_s2 + $0x50] sm:$0xff]  ;;  %vm502_vm1 = vcmask 1041408  }
  0x12   :  { %v909_v8 = vor.u32 %v964_v6, %v906_v7  ;;  %v110_v11 = vld [vmem:[%s1487_s2 + $0x48] sm:$0xff]  ;;  %171 = vperm.xlu1 %987, %v112_v10   ;;  %v109_v13 = vld [vmem:[%s1487_s2 + $0x40] sm:$0xff]  ;;  %v107_v14 = vld [vmem:[%s1487_s2 + $0x30] sm:$0xff]  ;;  %vm489_vm2 = vcmask 818176   ;;  %vm660_vm3 = vcmask 1040384   ;;  %vm653_vm4 = vcmask 408576  }
  0x13   :  { %251 = vmatpush.bf16.msra.mxu0 %v905_v5  ;;  %161 = vperm.xlu2 %988, %v110_v11   ;;  %v108_v15 = vld [vmem:[%s1487_s2 + $0x38] sm:$0xff]  ;;  %v105_v16 = vld [vmem:[%s1487_s2 + $0x20] sm:$0xff]  ;;  %v106_v17 = vld [vmem:[%s1487_s2 + $0x28] sm:$0xff]  ;;  %vm756_vm5 = vcmask 1046528   ;;  %vm752_vm6 = vcmask 244736   ;;  %vm817_vm7 = vcmask 1044480  }
  0x14   :  { %294 = vmatpush.bf16.msra.mxu1 %v909_v8  ;;  %v967_v18 = vld [vmem:[%s1486_s1 + $0x8] sm:$0xff]  ;;  %v103_v19 = vld [vmem:[%s1487_s2 + $0x10] sm:$0xff]  ;;  %v104_v20 = vld [vmem:[%s1487_s2 + $0x18] sm:$0xff]  ;;  %vm813_vm8 = vcmask 80896  }
  0x15   :  { %v101_v21 = vld [vmem:[%s1487_s2] sm:$0xff]  ;;  %v102_v22 = vld [vmem:[%s1487_s2 + $0x8] sm:$0xff]  ;;  %v968_v23 = vld [vmem:[%s1486_s1 + $0x10] sm:$0xff]  ;;  %s867_s2 = sshll.u32 %s1500_s15, 4  ;;  %s868_s2 = int_to_ptr.hbm [resolvable:$true] %s867_s2 }
  0x16   :  { %910 = vmatmul.msk.bf16.vlgmr.msra.gmra.mxu0 %vm222_vm0, %v966_v9  ;;  %v435_v24 = vld [vmem:[%s1489_s4 + $0x30] sm:$0x3]  ;;  %v434_v25 = vld [vmem:[%s1489_s4 + $0x28] sm:$0xff]  ;;  %v969_v27 = vld [vmem:[%s1486_s1 + $0x18] sm:$0xff] }
  0x17   :  { %917 = vmatmul.msk.bf16.vlgmr.msra.gmra.mxu1 %vm222_vm0, %v966_v9  ;;  %v431_v26 = vld [vmem:[%s1489_s4 + $0x10] sm:$0xff]  ;;  %v429_v28 = vld [vmem:[%s1489_s4] sm:$0xff]  ;;  %v430_v29 = vld [vmem:[%s1489_s4 + $0x8] sm:$0xff] }
  0x18   :  { %v622_v30 = vld [vmem:[%s1491_s6 + $0x18] sm:$0x3f]  ;;  %v619_v31 = vld [vmem:[%s1491_s6] sm:$0xff]  ;;  %v736_v35 = vld [vmem:[%s1493_s8 + $0x8] sm:$0x3] }
  0x19   :  { %166 = vperm.xlu0 %986, %v111_v12   ;;  %v970_v32 = vld [vmem:[%s1486_s1 + $0x20] sm:$0xff]  ;;  %v432_v36 = vld [vmem:[%s1489_s4 + $0x18] sm:$0xff]  ;;  %v971_v37 = vld [vmem:[%s1486_s1 + $0x28] sm:$0xff] }
  0x1a   :  { %156 = vperm.xlu1 %987, %v109_v13   ;;  %v735_v33 = vld [vmem:[%s1493_s8] sm:$0xff]  ;;  %v621_v38 = vld [vmem:[%s1491_s6 + $0x10] sm:$0xff]  ;;  %v620_v40 = vld [vmem:[%s1491_s6 + $0x8] sm:$0xff] }
  0x1b   :  { %146 = vperm.xlu2 %988, %v107_v14   ;;  %v433_v34 = vld [vmem:[%s1489_s4 + $0x20] sm:$0xff]  ;;  %v100_v39 = vld [vmem:[%s1486_s1 + $0x30] sm:$0x3] }
  0x1c   :  { %v204_v41 = vunpack.c.l.b16 %v100_v39  ;;  %v806_v43 = vld [vmem:[#allocation2] sm:$0x1]  ;;  %v356_v0 = vld [vmem:[#allocation6] sm:$0xff]  ;;  %v358_v6 = vld [vmem:[#allocation6 + $0x10] sm:$0xff] }
  0x1d   :  { %v357_v5 = vld [vmem:[#allocation6 + $0x8] sm:$0xff]  ;;  %v359_v7 = vld [vmem:[#allocation6 + $0x18] sm:$0xff] }
  0x1e   :  { %v211_v42 = vpack.c.b16 %v204_v41, %v204_v41 }
  0x21   :  { %151 = vperm.xlu0 %986, %v108_v15  }
  0x22   :  { %136 = vperm.xlu1 %987, %v105_v16  }
  0x23   :  { %141 = vperm.xlu2 %988, %v106_v17  }
  0x26   :  { %911 = vmatmul.msk.bf16.gmra.mxu0 %vm222_vm0, %v967_v18 }
  0x27   :  { %918 = vmatmul.msk.bf16.gmra.mxu1 %vm222_vm0, %v967_v18 }
  0x29   :  { %126 = vperm.xlu0 %986, %v103_v19  }
  0x2a   :  { %131 = vperm.xlu1 %987, %v104_v20  }
  0x2b   :  { %116 = vperm.xlu2 %988, %v101_v21  }
  0x31   :  { %121 = vperm.xlu0 %986, %v102_v22  }
  0x32   :  { %468 = vperm.xlu1 %987, %v435_v24  }
  0x33   :  { %458 = vperm.xlu2 %988, %v433_v34  }
  0x36   :  { %912 = vmatmul.msk.bf16.gmra.mxu0 %vm222_vm0, %v968_v23 }
  0x37   :  { %919 = vmatmul.msk.bf16.gmra.mxu1 %vm222_vm0, %v968_v23  ;;  %v360_v23 = vld [vmem:[#allocation6 + $0x20] sm:$0xff] }
  0x39   :  { %463 = vperm.xlu0 %986, %v434_v25   ;;  %v362_v25 = vld [vmem:[#allocation6 + $0x30] sm:$0xff] }
  0x3a   :  { %448 = vperm.xlu1 %987, %v431_v26  }
  0x3b   :  { %453 = vperm.xlu2 %988, %v432_v36  }
  0x41   :  { %438 = vperm.xlu0 %986, %v429_v28  }
  0x42   :  { %443 = vperm.xlu1 %987, %v430_v29   ;;  %v363_v29 = vld [vmem:[#allocation6 + $0x38] sm:$0xff] }
  0x43   :  { %635 = vperm.xlu2 %988, %v621_v38  }
  0x46   :  { %913 = vmatmul.msk.bf16.gmra.mxu0 %vm222_vm0, %v969_v27 }
  0x47   :  { %920 = vmatmul.msk.bf16.gmra.mxu1 %vm222_vm0, %v969_v27  ;;  %v361_v27 = vld [vmem:[#allocation6 + $0x28] sm:$0xff] }
  0x49   :  { %640 = vperm.xlu0 %986, %v622_v30  }
  0x4a   :  { %625 = vperm.xlu1 %987, %v619_v31  }
  0x4b   :  { %630 = vperm.xlu2 %988, %v620_v40  }
  0x51   :  { %739 = vperm.xlu0 %986, %v735_v33  }
  0x52   :  { %744 = vperm.xlu1 %987, %v736_v35  }
  0x53   :  { %809 = vperm.xlu2 %988, %v806_v43  }
  0x56   :  { %914 = vmatmul.msk.bf16.gmra.mxu0 %vm222_vm0, %v970_v32 }
  0x57   :  { %921 = vmatmul.msk.bf16.gmra.mxu1 %vm222_vm0, %v970_v32 }
  0x66   :  { %915 = vmatmul.msk.bf16.gmra.mxu0 %vm222_vm0, %v971_v37 }
  0x67   :  { %922 = vmatmul.msk.bf16.gmra.mxu1 %vm222_vm0, %v971_v37 }
  0x6d   :  { %v1289_v44 = vpop.permute.xlu2 %161 }
  0x75   :  { %v1293_v46 = vpop.permute.xlu2 %146 }
  0x76   :  { %916 = vmatmul.msk.bf16.gmra.mxu0 %vm222_vm0, %v211_v42 }
  0x77   :  { %923 = vmatmul.msk.bf16.gmra.mxu1 %vm222_vm0, %v211_v42 }
  0x7d   :  { %v1299_v49 = vpop.permute.xlu2 %141 }
  0x83   :  { %v1291_v45 = vpop.permute.xlu0 %176 }
  0x84   :  { %v1297_v48 = vpop.permute.xlu1 %171 }
  0x85   :  { %v117_v56 = vpop.permute.xlu2 %116 }
  0x8b   :  { %v1295_v47 = vpop.permute.xlu0 %166 }
  0x8c   :  { %v1303_v53 = vpop.permute.xlu1 %156 }
  0x93   :  { %v1301_v50 = vpop.permute.xlu0 %151  ;;  %v253_v51 = vpop.f32.mrf.mxu0 }
  0x94   :  { %v296_v52 = vpop.f32.mrf.mxu1  ;;  %v254_v58 = vadd.f32 %v253_v51, %v117_v56  ;;  %v137_v59 = vpop.permute.xlu1 %136 }
  0x95   :  { %v297_v60 = vadd.f32 %v296_v52, %v117_v56  ;;  %v364_v52 = vld [vmem:[#allocation6 + $0x40] sm:$0xff] }
  0x96   :  { %v330_v61 = vmax.f32 %v254_v58, 0.0 }
  0x97   :  { %v331_v1 = vmax.f32 %v297_v60, 0.0  ;;  %v367_v60 = vld [vmem:[#allocation6 + $0x58] sm:$0xff] }
  0x98   :  { %v1305_v10 = vmul.f32 %v356_v0, %v330_v61 }
  0x99   :  { %v1307_v11 = vmul.f32 %v357_v5, %v331_v1 }
  0x9b   :  { %v127_v54 = vpop.permute.xlu0 %126  ;;  %v255_v55 = vpop.f32.mrf.mxu0 }
  0x9c   :  { %v298_v57 = vpop.f32.mrf.mxu1  ;;  %v132_v16 = vpop.permute.xlu1 %131 }
  0xa3   :  { %v122_v62 = vpop.permute.xlu0 %121  ;;  %v258_v63 = vpop.f32.mrf.mxu0 }
  0xa4   :  { %v256_v2 = vadd.f32 %v255_v55, %v122_v62  ;;  %v299_v3 = vadd.f32 %v298_v57, %v122_v62  ;;  %v301_v4 = vpop.f32.mrf.mxu1  ;;  %v259_v12 = vadd.f32 %v258_v63, %v127_v54  ;;  %v366_v55 = vld [vmem:[#allocation6 + $0x50] sm:$0xff]  ;;  %v365_v57 = vld [vmem:[#allocation6 + $0x48] sm:$0xff] }
  0xa5   :  { %v302_v15 = vadd.f32 %v301_v4, %v127_v54 }
  0xa6   :  { %v332_v8 = vmax.f32 %v256_v2, 0.0  ;;  %v333_v9 = vmax.f32 %v299_v3, 0.0  ;;  %v334_v20 = vmax.f32 %v259_v12, 0.0 }
  0xa7   :  { %v335_v24 = vmax.f32 %v302_v15, 0.0 }
  0xa8   :  { %v1309_v13 = vmul.f32 %v358_v6, %v332_v8  ;;  %v1311_v14 = vmul.f32 %v359_v7, %v333_v9  ;;  %v1317_v31 = vmul.f32 %v360_v23, %v334_v20 }
  0xa9   :  { %v1321_v33 = vmul.f32 %v361_v27, %v335_v24  ;;  %v380_v27 = vld [vmem:[#allocation6 + $0xc0] sm:$0xf] }
  0xaa   :  { %v408_v17 = vpack.c.bf16 %v1309_v13, %v1305_v10  ;;  %v409_v18 = vpack.c.bf16 %v1311_v14, %v1307_v11  ;;  %v428_v10 = vld [vmem:[%s1488_s3 + $0x18] sm:$0x1] }
  0xab   :  { %v260_v19 = vpop.f32.mrf.mxu0  ;;  %v484_v11 = vunpack.c.l.b16 %v428_v10 }
  0xac   :  { %v261_v21 = vadd.f32 %v260_v19, %v132_v16  ;;  %v303_v22 = vpop.f32.mrf.mxu1 }
  0xad   :  { %v304_v26 = vadd.f32 %v303_v22, %v132_v16  ;;  %v488_v13 = vpack.c.b16 %v484_v11, %v484_v11 }
  0xae   :  { %v336_v28 = vmax.f32 %v261_v21, 0.0 }
  0xaf   :  { %v337_v30 = vmax.f32 %v304_v26, 0.0 }
  0xb0   :  { %v1319_v32 = vmul.f32 %v362_v25, %v336_v28 }
  0xb1   :  { %v1323_v34 = vmul.f32 %v363_v29, %v337_v30  ;;  %v381_v30 = vld [vmem:[#allocation6 + $0xc8] sm:$0xf] }
  0xb2   :  { %v410_v35 = vpack.c.bf16 %v1319_v32, %v1317_v31  ;;  %v973_v31 = vld [vmem:[%s1488_s3 + $0x8] sm:$0xff]  ;;  %v974_v32 = vld [vmem:[%s1488_s3 + $0x10] sm:$0xff] }
  0xb3   :  { %v263_v36 = vpop.f32.mrf.mxu0  ;;  %v411_v37 = vpack.c.bf16 %v1323_v34, %v1321_v33 }
  0xb4   :  { %v306_v38 = vpop.f32.mrf.mxu1  ;;  %v264_v39 = vadd.f32 %v263_v36, %v137_v59 }
  0xb5   :  { %v307_v40 = vadd.f32 %v306_v38, %v137_v59 }
  0xb6   :  { %v338_v42 = vmax.f32 %v264_v39, 0.0 }
  0xb7   :  { %v339_v54 = vmax.f32 %v307_v40, 0.0 }
  0xb8   :  { %v1331_v62 = vmul.f32 %v364_v52, %v338_v42  ;;  %v379_v52 = vld [vmem:[#allocation6 + $0xb8] sm:$0xff] }
  0xb9   :  { %v1335_v0 = vmul.f32 %v365_v57, %v339_v54 }
  0xbb   :  { %v265_v41 = vpop.f32.mrf.mxu0 }
  0xbc   :  { %v266_v43 = vadd.f32 %v265_v41, %v1299_v49  ;;  %v308_v51 = vpop.f32.mrf.mxu1  ;;  %v378_v41 = vld [vmem:[#allocation6 + $0xb0] sm:$0xff] }
  0xbd   :  { %v309_v56 = vadd.f32 %v308_v51, %v1299_v49 }
  0xbe   :  { %v340_v58 = vmax.f32 %v266_v43, 0.0 }
  0xbf   :  { %v341_v61 = vmax.f32 %v309_v56, 0.0 }
  0xc0   :  { %v1333_v63 = vmul.f32 %v366_v55, %v340_v58 }
  0xc1   :  { %v1337_v59 = vmul.f32 %v367_v60, %v341_v61  ;;  %v377_v60 = vld [vmem:[#allocation6 + $0xa8] sm:$0xff] }
  0xc2   :  { %v412_v1 = vpack.c.bf16 %v1333_v63, %v1331_v62 }
  0xc3   :  { %v268_v2 = vpop.f32.mrf.mxu0  ;;  %v413_v3 = vpack.c.bf16 %v1337_v59, %v1335_v0  ;;  %v469_v59 = vpop.permute.xlu1 %468 }
  0xc4   :  { %v311_v49 = vpop.f32.mrf.mxu1 }
  0xcb   :  { %v270_v4 = vpop.f32.mrf.mxu0 }
  0xcc   :  { %v313_v5 = vpop.f32.mrf.mxu1  ;;  %v271_v57 = vadd.f32 %v270_v4, %v1301_v50 }
  0xd3   :  { %v273_v6 = vpop.f32.mrf.mxu0 }
  0xd4   :  { %v316_v7 = vpop.f32.mrf.mxu1  ;;  %v274_v43 = vadd.f32 %v273_v6, %v1303_v53 }
  0xd5   :  { %v317_v54 = vadd.f32 %v316_v7, %v1303_v53  ;;  %v269_v53 = vadd.f32 %v268_v2, %v1293_v46 }
  0xd6   :  { %v346_v7 = vmax.f32 %v274_v43, 0.0 }
  0xdb   :  { %v275_v8 = vpop.f32.mrf.mxu0 }
  0xdc   :  { %v318_v9 = vpop.f32.mrf.mxu1  ;;  %v276_v36 = vadd.f32 %v275_v8, %v1289_v44 }
  0xdd   :  { %v319_v40 = vadd.f32 %v318_v9, %v1289_v44  ;;  %v314_v9 = vadd.f32 %v313_v5, %v1301_v50  ;;  %v344_v50 = vmax.f32 %v271_v57, 0.0  ;;  %v373_v5 = vld [vmem:[#allocation6 + $0x88] sm:$0xff]  ;;  %v449_v57 = vpop.permute.xlu1 %448 }
  0xde   :  { %v348_v58 = vmax.f32 %v276_v36, 0.0  ;;  %v342_v36 = vmax.f32 %v269_v53, 0.0 }
  0xdf   :  { %v349_v6 = vmax.f32 %v319_v40, 0.0  ;;  %v368_v40 = vld [vmem:[#allocation6 + $0x60] sm:$0xff] }
  0xe3   :  { %v278_v12 = vpop.f32.mrf.mxu0 }
  0xe4   :  { %v321_v15 = vpop.f32.mrf.mxu1  ;;  %v279_v25 = vadd.f32 %v278_v12, %v1295_v47  ;;  %v374_v12 = vld [vmem:[#allocation6 + $0x90] sm:$0xff] }
  0xe5   :  { %v322_v28 = vadd.f32 %v321_v15, %v1295_v47  ;;  %v376_v47 = vld [vmem:[#allocation6 + $0xa0] sm:$0xff] }
  0xe6   :  { %v350_v51 = vmax.f32 %v279_v25, 0.0 }
  0xe7   :  { %v351_v55 = vmax.f32 %v322_v28, 0.0  ;;  %v370_v28 = vld [vmem:[#allocation6 + $0x70] sm:$0xff] }
  0xe9   :  { %v403_v25 = vmul.f32 %v377_v60, %v351_v55  ;;  %v972_v55 = vld [vmem:[%s1488_s3] sm:$0xff] }
  0xeb   :  { %v280_v16 = vpop.f32.mrf.mxu0 }
  0xec   :  { %v323_v19 = vpop.f32.mrf.mxu1  ;;  %v281_v20 = vadd.f32 %v280_v16, %v1297_v48 }
  0xed   :  { %v324_v22 = vadd.f32 %v323_v19, %v1297_v48 }
  0xee   :  { %v352_v38 = vmax.f32 %v281_v20, 0.0  ;;  %v375_v20 = vld [vmem:[#allocation6 + $0x98] sm:$0xff] }
  0xef   :  { %v353_v48 = vmax.f32 %v324_v22, 0.0  ;;  %v312_v22 = vadd.f32 %v311_v49, %v1293_v46  ;;  %v369_v46 = vld [vmem:[#allocation6 + $0x68] sm:$0xff]  ;;  %v396_v49 = vmul.f32 %v370_v28, %v344_v50  ;;  %v444_v28 = vpop.permute.xlu1 %443 }
  0xf0   :  { %v404_v61 = vmul.f32 %v378_v41, %v352_v38  ;;  %v371_v38 = vld [vmem:[#allocation6 + $0x78] sm:$0xff] }
  0xf1   :  { %v405_v15 = vmul.f32 %v379_v52, %v353_v48  ;;  %v343_v41 = vmax.f32 %v312_v22, 0.0  ;;  %v394_v52 = vmul.f32 %v368_v40, %v342_v36  ;;  %v588_v40 = vld [vmem:[%s1497_s12 + $0x48] sm:$0xff] }
  0xf3   :  { %v283_v21 = vpop.f32.mrf.mxu0  ;;  %v419_v2 = vpack.c.bf16 %v405_v15, %v403_v25  ;;  %v591_v15 = vld [vmem:[%s1497_s12 + $0x60] sm:$0x3] }
  0xf4   :  { %v284_v23 = vadd.f32 %v283_v21, %v1291_v45  ;;  %v326_v24 = vpop.f32.mrf.mxu1  ;;  %v402_v21 = vmul.f32 %v376_v47, %v350_v51 }
  0xf5   :  { %v327_v26 = vadd.f32 %v326_v24, %v1291_v45  ;;  %v347_v24 = vmax.f32 %v317_v54, 0.0  ;;  %v414_v54 = vpack.c.bf16 %v396_v49, %v394_v52 }
  0xf6   :  { %v354_v29 = vmax.f32 %v284_v23, 0.0  ;;  %v372_v23 = vld [vmem:[#allocation6 + $0x80] sm:$0xff] }
  0xf7   :  { %v355_v39 = vmax.f32 %v327_v26, 0.0  ;;  %v400_v26 = vmul.f32 %v374_v12, %v348_v58  ;;  %v399_v48 = vmul.f32 %v373_v5, %v347_v24  ;;  %v464_v58 = vpop.permute.xlu0 %463 }
  0xf8   :  { %v406_v42 = vmul.f32 %v380_v27, %v354_v29  ;;  %v418_v27 = vpack.c.bf16 %v404_v61, %v402_v21  ;;  %v345_v29 = vmax.f32 %v314_v9, 0.0 }
  0xf9   :  { %v407_v45 = vmul.f32 %v381_v30, %v355_v39  ;;  %v401_v30 = vmul.f32 %v375_v20, %v349_v6  ;;  %v398_v39 = vmul.f32 %v372_v23, %v346_v7  ;;  %v592_v7 = vld [vmem:[%s1497_s12 + $0x68] sm:$0x3]  ;;  %v589_v23 = vld [vmem:[%s1497_s12 + $0x50] sm:$0xff] }
  0xfa   :  { %v420_v56 = vpack.c.bf16 %v406_v42, %v406_v42  ;;  %v397_v43 = vmul.f32 %v371_v38, %v345_v29 }
  0xfb   :  { %v285_v44 = vpop.f32.mrf.mxu0  ;;  %v421_v8 = vpack.c.bf16 %v407_v45, %v407_v45  ;;  %v416_v42 = vpack.c.bf16 %v400_v26, %v398_v39  ;;  %v417_v51 = vpack.c.bf16 %v401_v30, %v399_v48  ;;  %v395_v45 = vmul.f32 %v369_v46, %v343_v41  ;;  %v590_v26 = vld [vmem:[%s1497_s12 + $0x58] sm:$0xff]  ;;  %v587_v30 = vld [vmem:[%s1497_s12 + $0x40] sm:$0xff] }
  0xfc   :  { %v328_v16 = vpop.f32.mrf.mxu1  ;;  %v504_v19 = vsel %vm502_vm1, %v420_v56, 0 }
  0xfd   :  { %510 = vmatpush.bf16.msra.mxu2 %v504_v19  ;;  %v507_v4 = vsel %vm502_vm1, %v421_v8, 0  ;;  %v415_v47 = vpack.c.bf16 %v397_v43, %v395_v45  ;;  %v585_v43 = vld [vmem:[%s1497_s12 + $0x30] sm:$0xff] }
  0xfe   :  { %538 = vmatpush.bf16.msra.mxu3 %v507_v4 }
  0xff   :  { %v439_v49 = vpop.permute.xlu0 %438 }
 0x101   :  { %511 = vmatpush.bf16.msra.mxu2 %v418_v27 }
 0x102   :  { %539 = vmatpush.bf16.msra.mxu3 %v419_v2 }
 0x105   :  { %512 = vmatpush.bf16.msra.mxu2 %v416_v42 }
 0x106   :  { %540 = vmatpush.bf16.msra.mxu3 %v417_v51 }
 0x109   :  { %513 = vmatpush.bf16.msra.mxu2 %v414_v54 }
 0x10a   :  { %541 = vmatpush.bf16.msra.mxu3 %v415_v47 }
 0x10d   :  { %514 = vmatpush.bf16.msra.mxu2 %v412_v1 }
 0x10e   :  { %542 = vmatpush.bf16.msra.mxu3 %v413_v3  ;;  %v459_v3 = vpop.permute.xlu2 %458 }
 0x111   :  { %515 = vmatpush.bf16.msra.mxu2 %v410_v35 }
 0x112   :  { %543 = vmatpush.bf16.msra.mxu3 %v411_v37 }
 0x115   :  { %516 = vmatpush.bf16.msra.mxu2 %v408_v17 }
 0x116   :  { %544 = vmatpush.bf16.msra.mxu3 %v409_v18  ;;  %v454_v16 = vpop.permute.xlu2 %453 }
 0x118   :  { %936 = vmatmul.msk.bf16.vlgmr.msra.gmra.mxu2 %vm489_vm2, %v972_v55 }
 0x119   :  { %940 = vmatmul.msk.bf16.vlgmr.msra.gmra.mxu3 %vm489_vm2, %v972_v55 }
 0x128   :  { %937 = vmatmul.msk.bf16.gmra.mxu2 %vm489_vm2, %v973_v31 }
 0x129   :  { %941 = vmatmul.msk.bf16.gmra.mxu3 %vm489_vm2, %v973_v31  ;;  %v586_v31 = vld [vmem:[%s1497_s12 + $0x38] sm:$0xff] }
 0x138   :  { %938 = vmatmul.msk.bf16.gmra.mxu2 %vm489_vm2, %v974_v32 }
 0x139   :  { %942 = vmatmul.msk.bf16.gmra.mxu3 %vm489_vm2, %v974_v32 }
 0x148   :  { %939 = vmatmul.msk.bf16.gmra.mxu2 %vm489_vm2, %v488_v13 }
 0x149   :  { %943 = vmatmul.msk.bf16.gmra.mxu3 %vm489_vm2, %v488_v13  ;;  %v583_v13 = vld [vmem:[%s1497_s12 + $0x20] sm:$0xff] }
 0x19b   :  { %v518_v14 = vpop.f32.mrf.mxu2 }
 0x19c   :  { %v1389_v17 = vpop.f32.mrf.mxu3  ;;  %v519_v47 = vadd.f32 %v518_v14, %v439_v49  ;;  %v584_v14 = vld [vmem:[%s1497_s12 + $0x28] sm:$0xff] }
 0x19d   :  { %v547_v11 = vadd.f32 %v1389_v17, %v439_v49  ;;  %v719_v49 = vld [vmem:[%s1498_s13 + $0x30] sm:$0x3f] }
 0x1a3   :  { %v520_v18 = vpop.f32.mrf.mxu2 }
 0x1a4   :  { %v548_v33 = vpop.f32.mrf.mxu3  ;;  %v521_v38 = vadd.f32 %v520_v18, %v444_v28 }
 0x1a5   :  { %v549_v42 = vadd.f32 %v548_v33, %v444_v28  ;;  %v641_v28 = vpop.permute.xlu0 %640 }
 0x1ab   :  { %v523_v34 = vpop.f32.mrf.mxu2 }
 0x1ac   :  { %v551_v35 = vpop.f32.mrf.mxu3  ;;  %v524_v50 = vadd.f32 %v523_v34, %v449_v57  ;;  %v567_v34 = vmax.f32 %v521_v38, 0.0 }
 0x1ad   :  { %v552_v29 = vadd.f32 %v551_v35, %v449_v57  ;;  %v566_v57 = vmax.f32 %v547_v11, 0.0 }
 0x1ae   :  { %v569_v55 = vmax.f32 %v524_v50, 0.0 }
 0x1af   :  { %v570_v18 = vmax.f32 %v552_v29, 0.0 }
 0x1b3   :  { %v525_v37 = vpop.f32.mrf.mxu2 }
 0x1b4   :  { %v553_v62 = vpop.f32.mrf.mxu3  ;;  %v526_v20 = vadd.f32 %v525_v37, %v454_v16 }
 0x1b5   :  { %v554_v22 = vadd.f32 %v553_v62, %v454_v16  ;;  %v581_v62 = vld [vmem:[%s1497_s12 + $0x10] sm:$0xff] }
 0x1b6   :  { %v571_v39 = vmax.f32 %v526_v20, 0.0 }
 0x1b7   :  { %v572_v51 = vmax.f32 %v554_v22, 0.0 }
 0x1b8   :  { %v599_v35 = vmul.f32 %v585_v43, %v571_v39 }
 0x1b9   :  { %v600_v17 = vmul.f32 %v586_v31, %v572_v51  ;;  %v718_v51 = vld [vmem:[%s1498_s13 + $0x28] sm:$0xff] }
 0x1bb   :  { %v528_v63 = vpop.f32.mrf.mxu2 }
 0x1bc   :  { %v556_v0 = vpop.f32.mrf.mxu3  ;;  %v529_v12 = vadd.f32 %v528_v63, %v459_v3  ;;  %v568_v63 = vmax.f32 %v549_v42, 0.0 }
 0x1bd   :  { %v557_v19 = vadd.f32 %v556_v0, %v459_v3  ;;  %v597_v3 = vmul.f32 %v583_v13, %v569_v55  ;;  %v715_v55 = vld [vmem:[%s1498_s13 + $0x10] sm:$0xff]  ;;  %v716_v13 = vld [vmem:[%s1498_s13 + $0x18] sm:$0xff] }
 0x1be   :  { %v573_v5 = vmax.f32 %v529_v12, 0.0 }
 0x1bf   :  { %v574_v2 = vmax.f32 %v557_v19, 0.0  ;;  %v975_v19 = vld [vmem:[#allocation3] sm:$0xff] }
 0x1c0   :  { %v601_v32 = vmul.f32 %v587_v30, %v573_v5 }
 0x1c1   :  { %v602_v33 = vmul.f32 %v588_v40, %v574_v2  ;;  %v626_v2 = vpop.permute.xlu1 %625 }
 0x1c3   :  { %v530_v1 = vpop.f32.mrf.mxu2 }
 0x1c4   :  { %v558_v56 = vpop.f32.mrf.mxu3  ;;  %v531_v60 = vadd.f32 %v530_v1, %v464_v58  ;;  %v582_v1 = vld [vmem:[%s1497_s12 + $0x18] sm:$0xff] }
 0x1c5   :  { %v559_v44 = vadd.f32 %v558_v56, %v464_v58  ;;  %v579_v56 = vld [vmem:[%s1497_s12] sm:$0xff]  ;;  %v598_v58 = vmul.f32 %v584_v14, %v570_v18 }
 0x1c6   :  { %v575_v21 = vmax.f32 %v531_v60, 0.0  ;;  %v580_v60 = vld [vmem:[%s1497_s12 + $0x8] sm:$0xff] }
 0x1c7   :  { %v576_v24 = vmax.f32 %v559_v44, 0.0  ;;  %v609_v44 = vpack.c.bf16 %v599_v35, %v597_v3  ;;  %v958_v3 = vld [vmem:[%s1492_s7] sm:$0xf] }
 0x1c8   :  { %v603_v41 = vmul.f32 %v589_v23, %v575_v21 }
 0x1c9   :  { %v604_v52 = vmul.f32 %v590_v26, %v576_v24  ;;  %v636_v24 = vpop.permute.xlu2 %635 }
 0x1ca   :  { %v611_v37 = vpack.c.bf16 %v603_v41, %v601_v32 }
 0x1cb   :  { %v533_v61 = vpop.f32.mrf.mxu2  ;;  %v612_v0 = vpack.c.bf16 %v604_v52, %v602_v33 }
 0x1cc   :  { %v534_v8 = vadd.f32 %v533_v61, %v469_v59  ;;  %v561_v9 = vpop.f32.mrf.mxu3  ;;  %v595_v61 = vmul.f32 %v581_v62, %v567_v34  ;;  %v713_v34 = vld [vmem:[%s1498_s13] sm:$0xff] }
 0x1cd   :  { %v562_v6 = vadd.f32 %v561_v9, %v469_v59  ;;  %v565_v59 = vmax.f32 %v519_v47, 0.0  ;;  %v610_v9 = vpack.c.bf16 %v600_v17, %v598_v58 }
 0x1ce   :  { %v577_v53 = vmax.f32 %v534_v8, 0.0  ;;  %v596_v8 = vmul.f32 %v582_v1, %v568_v63 }
 0x1cf   :  { %v578_v4 = vmax.f32 %v562_v6, 0.0  ;;  %v593_v12 = vmul.f32 %v579_v56, %v565_v59  ;;  %v594_v6 = vmul.f32 %v580_v60, %v566_v57  ;;  %v977_v56 = vld [vmem:[%s1492_s7] sm:$0x10] }
 0x1d0   :  { %v605_v25 = vmul.f32 %v591_v15, %v577_v53  ;;  %v950_v53 = vld [vmem:[#allocation3 + $0x8] sm:$0xf] }
 0x1d1   :  { %v606_v27 = vmul.f32 %v592_v7, %v578_v4  ;;  %v607_v15 = vpack.c.bf16 %v595_v61, %v593_v12  ;;  %v608_v16 = vpack.c.bf16 %v596_v8, %v594_v6  ;;  %v976_v7 = vld [vmem:[#allocation3 + $0x8] sm:$0x70]  ;;  %v959_v61 = vor.u32 %v977_v56, %v958_v3 }
 0x1d2   :  { %v613_v36 = vpack.c.bf16 %v605_v25, %v605_v25  ;;  %v951_v20 = vor.u32 %v976_v7, %v950_v53 }
 0x1d3   :  { %v535_v48 = vpop.f32.mrf.mxu2  ;;  %v614_v46 = vpack.c.bf16 %v606_v27, %v606_v27  ;;  %v631_v27 = vpop.permute.xlu2 %630 }
 0x1d4   :  { %v563_v45 = vpop.f32.mrf.mxu3  ;;  %v662_v54 = vsel %vm660_vm3, %v613_v36, 0  ;;  %v717_v48 = vld [vmem:[%s1498_s13 + $0x20] sm:$0xff] }
 0x1d5   :  { %671 = vmatpush.bf16.msrb.mxu2 %v662_v54  ;;  %v665_v10 = vsel %vm660_vm3, %v614_v46, 0  ;;  %v720_v45 = vld [vmem:[%s1498_s13 + $0x38] sm:$0x3f] }
 0x1d6   :  { %690 = vmatpush.bf16.msrb.mxu3 %v665_v10 }
 0x1d9   :  { %672 = vmatpush.bf16.msrb.mxu2 %v611_v37  ;;  %v714_v37 = vld [vmem:[%s1498_s13 + $0x8] sm:$0xff] }
 0x1da   :  { %691 = vmatpush.bf16.msrb.mxu3 %v612_v0 }
 0x1dd   :  { %673 = vmatpush.bf16.msrb.mxu2 %v609_v44 }
 0x1de   :  { %692 = vmatpush.bf16.msrb.mxu3 %v610_v9  ;;  %v740_v9 = vpop.permute.xlu0 %739 }
 0x1e1   :  { %674 = vmatpush.bf16.msrb.mxu2 %v607_v15  ;;  %v745_v15 = vpop.permute.xlu1 %744 }
 0x1e2   :  { %693 = vmatpush.bf16.msrb.mxu3 %v608_v16 }
 0x1e4   :  { %952 = vmatmul.msk.bf16.vlgmr.msrb.gmra.mxu2 %vm653_vm4, %v975_v19 }
 0x1e5   :  { %954 = vmatmul.msk.bf16.vlgmr.msrb.gmra.mxu3 %vm653_vm4, %v975_v19 }
 0x1f4   :  { %953 = vmatmul.msk.bf16.gmra.mxu2 %vm653_vm4, %v951_v20 }
 0x1f5   :  { %955 = vmatmul.msk.bf16.gmra.mxu3 %vm653_vm4, %v951_v20  ;;  %v795_v20 = vld [vmem:[%s1499_s14] sm:$0xff] }
 0x267   :  { %v676_v21 = vpop.f32.mrf.mxu2 }
 0x268   :  { %v695_v4 = vpop.f32.mrf.mxu3  ;;  %v677_v41 = vadd.f32 %v676_v21, %v626_v2 }
 0x269   :  { %v696_v43 = vadd.f32 %v695_v4, %v626_v2  ;;  %v797_v4 = vld [vmem:[%s1499_s14 + $0x10] sm:$0x3] }
 0x26a   :  { %v705_v11 = vmax.f32 %v677_v41, 0.0 }
 0x26b   :  { %v706_v14 = vmax.f32 %v696_v43, 0.0 }
 0x26c   :  { %v721_v59 = vmul.f32 %v713_v34, %v705_v11 }
 0x26d   :  { %v722_v57 = vmul.f32 %v714_v37, %v706_v14 }
 0x26f   :  { %v678_v22 = vpop.f32.mrf.mxu2 }
 0x270   :  { %v697_v23 = vpop.f32.mrf.mxu3  ;;  %v679_v29 = vadd.f32 %v678_v22, %v631_v27 }
 0x271   :  { %v698_v36 = vadd.f32 %v697_v23, %v631_v27  ;;  %v796_v23 = vld [vmem:[%s1499_s14 + $0x8] sm:$0xff] }
 0x272   :  { %v707_v54 = vmax.f32 %v679_v29, 0.0 }
 0x273   :  { %v708_v31 = vmax.f32 %v698_v36, 0.0 }
 0x274   :  { %v723_v62 = vmul.f32 %v715_v55, %v707_v54 }
 0x275   :  { %v724_v17 = vmul.f32 %v716_v13, %v708_v31 }
 0x276   :  { %v729_v58 = vpack.c.bf16 %v723_v62, %v721_v59 }
 0x277   :  { %v681_v25 = vpop.f32.mrf.mxu2  ;;  %v730_v60 = vpack.c.bf16 %v724_v17, %v722_v57 }
 0x278   :  { %v700_v50 = vpop.f32.mrf.mxu3  ;;  %v682_v5 = vadd.f32 %v681_v25, %v636_v24  ;;  %v798_v25 = vld [vmem:[%s1499_s14 + $0x18] sm:$0x3]  ;;  %s1074_s14 = smov [#allocation8]  }
 0x279   :  { %v701_v26 = vadd.f32 %v700_v50, %v636_v24  ;;  %s865_s19 = sshll.u32 %s1074_s14, 4  ;;  %s866_s19 = int_to_ptr.vmem [resolvable:$true] %s865_s19 }
 0x27a   :  { %v709_v38 = vmax.f32 %v682_v5, 0.0 }
 0x27b   :  { %v710_v46 = vmax.f32 %v701_v26, 0.0 }
 0x27c   :  { %v725_v32 = vmul.f32 %v717_v48, %v709_v38  ;;  %v805_v38 = vld [vmem:[%s1494_s9] sm:$0x1]  ;;  %v855_v48 = vlaneseq }
 0x27d   :  { %v726_v18 = vmul.f32 %v718_v51, %v710_v46 }
 0x27e   :  { %vm857_vm9 = vcmp.lt.s32.totalorder %v855_v48, 256 }
 0x27f   :  { %v683_v30 = vpop.f32.mrf.mxu2 }
 0x280   :  { %v684_v39 = vadd.f32 %v683_v30, %v641_v28  ;;  %v702_v40 = vpop.f32.mrf.mxu3 }
 0x281   :  { %v703_v42 = vadd.f32 %v702_v40, %v641_v28 }
 0x282   :  { %v711_v52 = vmax.f32 %v684_v39, 0.0  ;;  %v810_v39 = vpop.permute.xlu2 %809 }
 0x283   :  { %v712_v47 = vmax.f32 %v703_v42, 0.0  ;;  %v812_v40 = vperm.slane %v810_v39, 0 }
 0x284   :  { %v727_v10 = vmul.f32 %v719_v49, %v711_v52 }
 0x285   :  { %v728_v33 = vmul.f32 %v720_v45, %v712_v47 }
 0x286   :  { %v731_v35 = vpack.c.bf16 %v727_v10, %v725_v32 }
 0x287   :  { %v732_v63 = vpack.c.bf16 %v728_v33, %v726_v18 }
 0x288   :  { %v758_v0 = vsel %vm756_vm5, %v731_v35, 0 }
 0x289   :  { %769 = vmatpush.bf16.msrb.mxu0 %v758_v0  ;;  %v761_v1 = vsel %vm756_vm5, %v732_v63, 0 }
 0x28a   :  { %783 = vmatpush.bf16.msrb.mxu1 %v761_v1 }
 0x28d   :  { %770 = vmatpush.bf16.msrb.mxu0 %v729_v58 }
 0x28e   :  { %784 = vmatpush.bf16.msrb.mxu1 %v730_v60 }
 0x290   :  { %960 = vmatmul.msk.bf16.vlgmr.msrb.gmra.mxu0 %vm752_vm6, %v959_v61 }
 0x291   :  { %961 = vmatmul.msk.bf16.vlgmr.msrb.gmra.mxu1 %vm752_vm6, %v959_v61 }
 0x30d   :  { %v772_v44 = vpop.f32.mrf.mxu0 }
 0x30e   :  { %v786_v8 = vpop.f32.mrf.mxu1  ;;  %v773_v12 = vadd.f32 %v772_v44, %v740_v9 }
 0x30f   :  { %v787_v6 = vadd.f32 %v786_v8, %v740_v9 }
 0x310   :  { %v791_v19 = vmax.f32 %v773_v12, 0.0 }
 0x311   :  { %v792_v21 = vmax.f32 %v787_v6, 0.0 }
 0x312   :  { %v799_v5 = vmul.f32 %v795_v20, %v791_v19 }
 0x313   :  { %v800_v27 = vmul.f32 %v796_v23, %v792_v21 }
 0x315   :  { %v774_v16 = vpop.f32.mrf.mxu0 }
 0x316   :  { %v775_v53 = vadd.f32 %v774_v16, %v745_v15  ;;  %v788_v7 = vpop.f32.mrf.mxu1 }
 0x317   :  { %v789_v22 = vadd.f32 %v788_v7, %v745_v15 }
 0x318   :  { %v793_v24 = vmax.f32 %v775_v53, 0.0 }
 0x319   :  { %v794_v50 = vmax.f32 %v789_v22, 0.0 }
 0x31a   :  { %v801_v26 = vmul.f32 %v797_v4, %v793_v24 }
 0x31b   :  { %v802_v28 = vmul.f32 %v798_v25, %v794_v50 }
 0x31c   :  { %v803_v29 = vpack.c.bf16 %v801_v26, %v799_v5 }
 0x31d   :  { %v804_v30 = vpack.c.bf16 %v802_v28, %v800_v27 }
 0x31e   :  { %v819_v2 = vsel %vm817_vm7, %v803_v29, 0 }
 0x31f   :  { %831 = vmatpush.bf16.msra.mxu2 %v819_v2  ;;  %v822_v36 = vsel %vm817_vm7, %v804_v30, 0 }
 0x320   :  { %844 = vmatpush.bf16.msra.mxu3 %v822_v36 }
 0x322   :  { %962 = vmatmul.msk.bf16.vlgmr.msra.gmra.mxu2 %vm813_vm8, %v805_v38 }
 0x323   :  { %963 = vmatmul.msk.bf16.vlgmr.msra.gmra.mxu3 %vm813_vm8, %v805_v38 }
 0x3a5   :  { %v833_v41 = vpop.f32.mrf.mxu2 }
 0x3a6   :  { %v846_v46 = vpop.f32.mrf.mxu3  ;;  %v834_v42 = vadd.f32 %v833_v41, %v812_v40 }
 0x3a7   :  { %v847_v49 = vadd.f32 %v846_v46, %v812_v40 }
 0x3a9   :  { %v852_v43 = vrot.slane %v847_v49, 7 }
 0x3ab   :  { %v853_v51 = vsel %vm660_vm3, %v834_v42, %v852_v43 }
 0x3ac   :  { %859 = vst.msk [vmem:[#allocation8] sm:$0x3] %vm857_vm9, %v853_v51 }
 0x3ad   :  { %v835_v52 = vpop.f32.mrf.mxu2  ;;  %870 = dma.vmem_to_hbm [thread:$0]  %s866_s19, 32, %s868_s2, [#allocation5]  }
 0x3ae   :  { %v848_v45 = vpop.f32.mrf.mxu3 }
 0x3af   :  { %1065 = dma.done.wait [#allocation5], 32  }
 0x3b0   :  { %1066 = vsyncadd [#allocation5], 4294967264 }
 0x3b1   :  { %875 = vsyncpa [#allocation4], 1 }
 0x3b2   :  { %876 = vsyncpa [#allocation7], 1 }
 0x3b3   :  { %877 = vsyncpa [#allocation5], 1 }

</bundles_post_ra>
